<compile_context>
chip_gen: v7x
topology: tpu7x:2x2x1
jax: 0.10.0
libtpu: 0.0.40
codegen_flags: <defaults>
</compile_context>

<pallas_src>
import functools
import math

import jax
import jax.numpy as jnp
from jax.experimental import pallas as pl
from jax.experimental.pallas import tpu as pltpu

_F32 = jnp.float32
_BF16 = jnp.bfloat16


def _erf(x):
    # Abramowitz & Stegun 7.1.26 (exp-only, Mosaic-safe); |err| < 1.5e-7,
    # i.e. well below bf16 matmul noise.
    a1, a2, a3, a4, a5 = (0.254829592, -0.284496736, 1.421413741,
                          -1.453152027, 1.061405429)
    p = 0.3275911
    sign = jnp.where(x >= 0.0, 1.0, -1.0)
    ax = jnp.abs(x)
    t = 1.0 / (1.0 + p * ax)
    poly = ((((a5 * t + a4) * t + a3) * t + a2) * t + a1) * t
    return sign * (1.0 - poly * jnp.exp(-ax * ax))


def _gelu_erf(x):
    # Exact (erf-based) GELU, matching torch's fused encoder-layer path.
    return 0.5 * x * (1.0 + _erf(x * (1.0 / math.sqrt(2.0))))


def _layer_norm(y, w, b, eps):
    mu = jnp.mean(y, axis=-1, keepdims=True)
    d = y - mu
    var = jnp.mean(d * d, axis=-1, keepdims=True)
    return d * jax.lax.rsqrt(var + eps) * w + b


def _bert_layer_kernel(xq_ref, xkv_ref,
                       wq_ref, bq_ref, wkv_ref, bkv_ref,
                       wo_ref, bo_ref,
                       w1_ref, b1_ref, w2_ref, b2_ref,
                       n1w_ref, n1b_ref, n2w_ref, n2b_ref,
                       out_ref,
                       *, num_heads, norm1_eps, norm2_eps):
    xq = xq_ref[0]                      # (TQ, E) residual / query rows (f32)
    xkv = xkv_ref[0]                    # (S,  E) full sequence for K/V  (f32)
    tq, e = xq.shape
    s = xkv.shape[0]
    hd = e // num_heads
    scale = 1.0 / math.sqrt(hd)

    # ---- projections: bf16 MXU operands, f32 accumulation ----
    q = jnp.dot(xq.astype(_BF16), wq_ref[...],
                preferred_element_type=_F32) + bq_ref[...]          # (TQ, E)
    kv = jnp.dot(xkv.astype(_BF16), wkv_ref[...],
                 preferred_element_type=_F32) + bkv_ref[...]        # (S, 2E)
    qb = q.astype(_BF16)
    kb = kv[:, :e].astype(_BF16)
    vb = kv[:, e:].astype(_BF16)

    # ---- multi-head self-attention (softmax in f32, matmuls in bf16) ----
    # Per-head score/context matmuls are inherently K=hd; the expensive parts
    # (per-head output projections + per-head full-width adds) are removed by
    # concatenating the contexts and doing ONE E-wide output projection.
    ctx_parts = []
    for h in range(num_heads):          # static unroll; H is small
        lo = h * hd
        qh = qb[:, lo:lo + hd]
        kh = kb[:, lo:lo + hd]
        vh = vb[:, lo:lo + hd]
        sc = jax.lax.dot_general(qh, kh, (((1,), (1,)), ((), ())),
                                 preferred_element_type=_F32) * scale
        sc = sc - jnp.max(sc, axis=-1, keepdims=True)
        p = jnp.exp(sc)
        p = p * pl.reciprocal(jnp.sum(p, axis=-1, keepdims=True), approx=True)
        ctx_parts.append(jnp.dot(p.astype(_BF16), vh,
                                 preferred_element_type=_F32))      # (TQ, hd)
    ctx = jnp.concatenate(ctx_parts, axis=-1)                       # (TQ, E)

    # ---- single E-wide output projection + residual + LayerNorm 1 ----
    attn = jnp.dot(ctx.astype(_BF16), wo_ref[...],
                   preferred_element_type=_F32) + bo_ref[...]
    h1 = _layer_norm(xq + attn, n1w_ref[...], n1b_ref[...], norm1_eps)

    # ---- feed-forward (bf16 MXU, f32 elementwise) + residual + LayerNorm 2 ----
    ff = _gelu_erf(jnp.dot(h1.astype(_BF16), w1_ref[...],
                           preferred_element_type=_F32) + b1_ref[...])
    y = jnp.dot(ff.astype(_BF16), w2_ref[...],
                preferred_element_type=_F32) + b2_ref[...]
    out = _layer_norm(h1 + y, n2w_ref[...], n2b_ref[...], norm2_eps)

    out_ref[0] = out.astype(out_ref.dtype)


def _pick_query_tile(s):
    for cand in (256, 128, 64, 32, 16, 8):
        if s % cand == 0:
            return cand
    return s  # short / odd sequence: single full tile (block == full dim)


def bert_layer_better_transformer(hidden_states, params, *, num_heads,
                                  attention_mask=None):
    """hidden_states: (B, S, E) f32 -> tuple of ((B, S, E) f32,)."""
    assert attention_mask is None  # eval path; see TODO at top of file.
    b, s, e = hidden_states.shape
    assert e % num_heads == 0

    w_in = params["in_proj_weight"]                 # (3E, E), rows [Wq; Wk; Wv]
    b_in = params["in_proj_bias"]                   # (3E,)
    # Pre-transpose so every kernel matmul is x @ W (lane-dense output);
    # store matmul weights in bf16 (MXU operands + half the resident VMEM).
    wq_t = w_in[:e].T.astype(_BF16)                 # (E, E)
    wkv_t = w_in[e:].T.astype(_BF16)                # (E, 2E)  [K | V]
    bq = b_in[:e].reshape(1, e).astype(_F32)
    bkv = b_in[e:].reshape(1, 2 * e).astype(_F32)
    wo_t = params["out_proj_weight"].T.astype(_BF16)        # (E, E)
    bo = params["out_proj_bias"].reshape(1, e).astype(_F32)
    w1_t = params["linear1_weight"].T.astype(_BF16)         # (E, I)
    inter = w1_t.shape[1]
    b1 = params["linear1_bias"].reshape(1, inter).astype(_F32)
    w2_t = params["linear2_weight"].T.astype(_BF16)         # (I, E)
    b2 = params["linear2_bias"].reshape(1, e).astype(_F32)
    n1w = params["norm1_weight"].reshape(1, e).astype(_F32)
    n1b = params["norm1_bias"].reshape(1, e).astype(_F32)
    n2w = params["norm2_weight"].reshape(1, e).astype(_F32)
    n2b = params["norm2_bias"].reshape(1, e).astype(_F32)

    tq = _pick_query_tile(s)
    n_q_tiles = s // tq

    kernel = functools.partial(_bert_layer_kernel,
                               num_heads=num_heads,
                               norm1_eps=float(params["norm1_eps"]),
                               norm2_eps=float(params["norm2_eps"]))

    weights = (wq_t, bq, wkv_t, bkv, wo_t, bo,
               w1_t, b1, w2_t, b2, n1w, n1b, n2w, n2b)

    def _resident(arr):
        # Full-array block with a constant index_map: DMA'd once and kept
        # resident across grid steps.
        # TODO(synk): pipeline_mode=pl.Buffered(1) would drop the second
        # (never-used) weight buffer; bf16 storage already halves it.
        return pl.BlockSpec(arr.shape, lambda bi, qi: (0, 0))

    # VMEM budget from the actual footprint, clamped to ~7/8 of this
    # generation's physical VMEM (v5e/v6e: 128 MiB, v7x: 64 MiB).
    weight_bytes = sum(int(w.size) * w.dtype.itemsize for w in weights)
    io_bytes = 2 * 4 * (tq * e + s * e + tq * e)          # double-buffered tiles
    act_bytes = 4 * (tq * 3 * e + s * 2 * e + 3 * tq * s
                     + tq * inter + 6 * tq * e)           # in-kernel temporaries
    try:
        vmem_cap = int(pltpu.get_tpu_info().vmem_capacity_bytes)
    except Exception:
        vmem_cap = 64 * 1024 * 1024
    vmem_limit = int(min(vmem_cap * 7 // 8,
                         max(2 * weight_bytes + io_bytes + act_bytes,
                             16 * 1024 * 1024)))

    out = pl.pallas_call(
        kernel,
        out_shape=jax.ShapeDtypeStruct((b, s, e), jnp.float32),
        grid=(b, n_q_tiles),
        in_specs=[
            # query / residual tile
            pl.BlockSpec((1, tq, e), lambda bi, qi: (bi, qi, 0)),
            # full sequence block for K/V (index independent of the q tile)
            pl.BlockSpec((1, s, e), lambda bi, qi: (bi, 0, 0)),
        ] + [_resident(w) for w in weights],
        out_specs=pl.BlockSpec((1, tq, e), lambda bi, qi: (bi, qi, 0)),
        compiler_params=pltpu.CompilerParams(
            dimension_semantics=("parallel", "parallel"),
            vmem_limit_bytes=vmem_limit),
    )(hidden_states, hidden_states, *weights)
    return (out,)


def reference(hidden_states, params, *, num_heads):
    """Pure-JAX mirror of the module's math (dropout=0) using the same
    bf16-operand / f32-accumulate matmul recipe as the kernel (so the
    comparison isolates structural bugs rather than bf16 rounding)."""
    b, s, e = hidden_states.shape
    hd = e // num_heads

    def mm(a, w):  # F.linear without bias: a @ w.T
        return jnp.dot(a.astype(_BF16), w.T.astype(_BF16),
                       preferred_element_type=_F32)

    x = hidden_states
    qkv = mm(x, params["in_proj_weight"]) + params["in_proj_bias"]
    qkv = qkv.reshape(b, s, 3, num_heads, hd).transpose(2, 0, 3, 1, 4)
    q, k, v = qkv[0], qkv[1], qkv[2]                           # (B, H, S, hd)
    sc = jnp.einsum("bhqd,bhkd->bhqk", q.astype(_BF16), k.astype(_BF16),
                    preferred_element_type=_F32) / math.sqrt(hd)
    p = jax.nn.softmax(sc, axis=-1)
    ctx = jnp.einsum("bhqk,bhkd->bhqd", p.astype(_BF16), v.astype(_BF16),
                     preferred_element_type=_F32)
    ctx = ctx.transpose(0, 2, 1, 3).reshape(b, s, e)
    attn = mm(ctx, params["out_proj_weight"]) + params["out_proj_bias"]
    h1 = _layer_norm(x + attn, params["norm1_weight"], params["norm1_bias"],
                     float(params["norm1_eps"]))
    ff = _gelu_erf(mm(h1, params["linear1_weight"]) + params["linear1_bias"])
    y = mm(ff, params["linear2_weight"]) + params["linear2_bias"]
    return _layer_norm(h1 + y, params["norm2_weight"], params["norm2_bias"],
                       float(params["norm2_eps"]))


if __name__ == "__main__":
    B, S, E, H = 2, 8, 32, 4          # batch, seq, hidden, heads
    INTER = 4 * E                     # BERT intermediate size

    keys = jax.random.split(jax.random.PRNGKey(0), 13)

    def nrm(k, shape, scale=0.05):
        return scale * jax.random.normal(k, shape, dtype=jnp.float32)

    params = {
        "in_proj_weight": nrm(keys[0], (3 * E, E)),
        "in_proj_bias": nrm(keys[1], (3 * E,)),
        "out_proj_weight": nrm(keys[2], (E, E)),
        "out_proj_bias": nrm(keys[3], (E,)),
        "linear1_weight": nrm(keys[4], (INTER, E)),
        "linear1_bias": nrm(keys[5], (INTER,)),
        "linear2_weight": nrm(keys[6], (E, INTER)),
        "linear2_bias": nrm(keys[7], (E,)),
        "norm1_weight": 1.0 + nrm(keys[8], (E,)),
        "norm1_bias": nrm(keys[9], (E,)),
        "norm2_weight": 1.0 + nrm(keys[10], (E,)),
        "norm2_bias": nrm(keys[11], (E,)),
        "norm1_eps": 1e-12,
        "norm2_eps": 1e-12,
    }
    x = jax.random.normal(keys[12], (B, S, E), dtype=jnp.float32)

    (out,) = bert_layer_better_transformer(x, params, num_heads=H)
    out = jax.block_until_ready(out)

    ref = reference(x, params, num_heads=H)
    assert out.shape == (B, S, E)
    max_err = float(jnp.max(jnp.abs(out - ref)))
    assert jnp.allclose(out, ref, atol=1e-2, rtol=1e-2), max_err
    print("KERNEL_OK")
</pallas_src>

<mosaic_0001>
module attributes {stable_mosaic.version = 11 : i64} {
  func.func @_bert_layer_kernel(%arg0: i32, %arg1: i32, %arg2: memref<1x8x32xf32, #tpu.memory_space<vmem>>, %arg3: memref<1x8x32xf32, #tpu.memory_space<vmem>>, %arg4: memref<32x32xbf16, #tpu.memory_space<vmem>>, %arg5: memref<1x32xf32, #tpu.memory_space<vmem>>, %arg6: memref<32x64xbf16, #tpu.memory_space<vmem>>, %arg7: memref<1x64xf32, #tpu.memory_space<vmem>>, %arg8: memref<32x32xbf16, #tpu.memory_space<vmem>>, %arg9: memref<1x32xf32, #tpu.memory_space<vmem>>, %arg10: memref<32x128xbf16, #tpu.memory_space<vmem>>, %arg11: memref<1x128xf32, #tpu.memory_space<vmem>>, %arg12: memref<128x32xbf16, #tpu.memory_space<vmem>>, %arg13: memref<1x32xf32, #tpu.memory_space<vmem>>, %arg14: memref<1x32xf32, #tpu.memory_space<vmem>>, %arg15: memref<1x32xf32, #tpu.memory_space<vmem>>, %arg16: memref<1x32xf32, #tpu.memory_space<vmem>>, %arg17: memref<1x32xf32, #tpu.memory_space<vmem>>, %arg18: memref<1x8x32xf32, #tpu.memory_space<vmem>>) attributes {dimension_semantics = [#tpu.dimension_semantics<parallel>, #tpu.dimension_semantics<parallel>], iteration_bounds = array<i64: 2, 1>, scalar_prefetch = 0 : i64, scratch_operands = 0 : i64, tpu.core_type = #tpu.core_type<tc>, window_params = [{transform_indices = @transform_0, window_bounds = array<i64: 1, 8, 32>}, {transform_indices = @transform_1, window_bounds = array<i64: 1, 8, 32>}, {pipeline_mode = #tpu.pipeline_mode<synchronous>, transform_indices = @transform_2, window_bounds = array<i64: 32, 32>}, {pipeline_mode = #tpu.pipeline_mode<synchronous>, transform_indices = @transform_3, window_bounds = array<i64: 1, 32>}, {pipeline_mode = #tpu.pipeline_mode<synchronous>, transform_indices = @transform_4, window_bounds = array<i64: 32, 64>}, {pipeline_mode = #tpu.pipeline_mode<synchronous>, transform_indices = @transform_5, window_bounds = array<i64: 1, 64>}, {pipeline_mode = #tpu.pipeline_mode<synchronous>, transform_indices = @transform_6, window_bounds = array<i64: 32, 32>}, {pipeline_mode = #tpu.pipeline_mode<synchronous>, transform_indices = @transform_7, window_bounds = array<i64: 1, 32>}, {pipeline_mode = #tpu.pipeline_mode<synchronous>, transform_indices = @transform_8, window_bounds = array<i64: 32, 128>}, {pipeline_mode = #tpu.pipeline_mode<synchronous>, transform_indices = @transform_9, window_bounds = array<i64: 1, 128>}, {pipeline_mode = #tpu.pipeline_mode<synchronous>, transform_indices = @transform_10, window_bounds = array<i64: 128, 32>}, {pipeline_mode = #tpu.pipeline_mode<synchronous>, transform_indices = @transform_11, window_bounds = array<i64: 1, 32>}, {pipeline_mode = #tpu.pipeline_mode<synchronous>, transform_indices = @transform_12, window_bounds = array<i64: 1, 32>}, {pipeline_mode = #tpu.pipeline_mode<synchronous>, transform_indices = @transform_13, window_bounds = array<i64: 1, 32>}, {pipeline_mode = #tpu.pipeline_mode<synchronous>, transform_indices = @transform_14, window_bounds = array<i64: 1, 32>}, {pipeline_mode = #tpu.pipeline_mode<synchronous>, transform_indices = @transform_15, window_bounds = array<i64: 1, 32>}, {transform_indices = @transform_16, window_bounds = array<i64: 1, 8, 32>}]} {
    %c0 = arith.constant 0 : index
    %c0_0 = arith.constant 0 : index
    %c0_1 = arith.constant 0 : index
    %0 = vector.load %arg2[%c0, %c0_0, %c0_1] : memref<1x8x32xf32, #tpu.memory_space<vmem>>, vector<1x8x32xf32>
    %1 = vector.shape_cast %0 : vector<1x8x32xf32> to vector<8x32xf32>
    %c0_2 = arith.constant 0 : index
    %c0_3 = arith.constant 0 : index
    %c0_4 = arith.constant 0 : index
    %2 = vector.load %arg3[%c0_2, %c0_3, %c0_4] : memref<1x8x32xf32, #tpu.memory_space<vmem>>, vector<1x8x32xf32>
    %3 = vector.shape_cast %2 : vector<1x8x32xf32> to vector<8x32xf32>
    %4 = arith.truncf %1 : vector<8x32xf32> to vector<8x32xbf16>
    %c0_5 = arith.constant 0 : index
    %c0_6 = arith.constant 0 : index
    %5 = vector.load %arg4[%c0_5, %c0_6] : memref<32x32xbf16, #tpu.memory_space<vmem>>, vector<32x32xbf16>
    %cst = arith.constant dense<0.000000e+00> : vector<8x32xf32>
    %6 = tpu.matmul %4, %5, %cst {dimension_numbers = #tpu.dot_dimension_numbers<[1], [0], [0], [1], [0, 0, 1, 1], [], []>} : vector<8x32xbf16>, vector<32x32xbf16>, vector<8x32xf32> -> vector<8x32xf32>
    %c0_7 = arith.constant 0 : index
    %c0_8 = arith.constant 0 : index
    %7 = vector.load %arg5[%c0_7, %c0_8] : memref<1x32xf32, #tpu.memory_space<vmem>>, vector<1x32xf32>
    %8 = vector.broadcast %7 : vector<1x32xf32> to vector<8x32xf32>
    %9 = arith.addf %6, %8 : vector<8x32xf32>
    %10 = arith.truncf %3 : vector<8x32xf32> to vector<8x32xbf16>
    %c0_9 = arith.constant 0 : index
    %c0_10 = arith.constant 0 : index
    %11 = vector.load %arg6[%c0_9, %c0_10] : memref<32x64xbf16, #tpu.memory_space<vmem>>, vector<32x64xbf16>
    %cst_11 = arith.constant dense<0.000000e+00> : vector<8x64xf32>
    %12 = tpu.matmul %10, %11, %cst_11 {dimension_numbers = #tpu.dot_dimension_numbers<[1], [0], [0], [1], [0, 0, 1, 1], [], []>} : vector<8x32xbf16>, vector<32x64xbf16>, vector<8x64xf32> -> vector<8x64xf32>
    %c0_12 = arith.constant 0 : index
    %c0_13 = arith.constant 0 : index
    %13 = vector.load %arg7[%c0_12, %c0_13] : memref<1x64xf32, #tpu.memory_space<vmem>>, vector<1x64xf32>
    %14 = vector.broadcast %13 : vector<1x64xf32> to vector<8x64xf32>
    %15 = arith.addf %12, %14 : vector<8x64xf32>
    %16 = arith.truncf %9 : vector<8x32xf32> to vector<8x32xbf16>
    %17 = vector.extract_strided_slice %15 {offsets = [0, 0], sizes = [8, 32], strides = [1, 1]} : vector<8x64xf32> to vector<8x32xf32>
    %18 = arith.truncf %17 : vector<8x32xf32> to vector<8x32xbf16>
    %19 = vector.extract_strided_slice %15 {offsets = [0, 32], sizes = [8, 32], strides = [1, 1]} : vector<8x64xf32> to vector<8x32xf32>
    %20 = arith.truncf %19 : vector<8x32xf32> to vector<8x32xbf16>
    %21 = vector.extract_strided_slice %16 {offsets = [0, 0], sizes = [8, 8], strides = [1, 1]} : vector<8x32xbf16> to vector<8x8xbf16>
    %22 = vector.extract_strided_slice %18 {offsets = [0, 0], sizes = [8, 8], strides = [1, 1]} : vector<8x32xbf16> to vector<8x8xbf16>
    %23 = vector.extract_strided_slice %20 {offsets = [0, 0], sizes = [8, 8], strides = [1, 1]} : vector<8x32xbf16> to vector<8x8xbf16>
    %cst_14 = arith.constant dense<0.000000e+00> : vector<8x8xf32>
    %24 = tpu.matmul %21, %22, %cst_14 {dimension_numbers = #tpu.dot_dimension_numbers<[1], [1], [0], [0], [0, 0, 1, 0], [], []>} : vector<8x8xbf16>, vector<8x8xbf16>, vector<8x8xf32> -> vector<8x8xf32>
    %cst_15 = arith.constant 0.353553385 : f32
    %25 = vector.broadcast %cst_15 : f32 to vector<8x8xf32>
    %26 = arith.mulf %24, %25 : vector<8x8xf32>
    %cst_16 = arith.constant dense<0xFF800000> : vector<8xf32>
    %27 = vector.multi_reduction <maximumf>, %26, %cst_16 [1] : vector<8x8xf32> to vector<8xf32>
    %28 = vector.shape_cast %27 : vector<8xf32> to vector<8x1xf32>
    %29 = vector.broadcast %28 : vector<8x1xf32> to vector<8x8xf32>
    %30 = arith.subf %26, %29 : vector<8x8xf32>
    %31 = math.exp %30 : vector<8x8xf32>
    %cst_17 = arith.constant dense<0.000000e+00> : vector<8xf32>
    %32 = vector.multi_reduction <add>, %31, %cst_17 [1] : vector<8x8xf32> to vector<8xf32>
    %33 = vector.shape_cast %32 : vector<8xf32> to vector<8x1xf32>
    %34 = tpu.reciprocal %33 {approx = true} : vector<8x1xf32> -> vector<8x1xf32>
    %35 = vector.broadcast %34 : vector<8x1xf32> to vector<8x8xf32>
    %36 = arith.mulf %31, %35 : vector<8x8xf32>
    %37 = arith.truncf %36 : vector<8x8xf32> to vector<8x8xbf16>
    %cst_18 = arith.constant dense<0.000000e+00> : vector<8x8xf32>
    %38 = tpu.matmul %37, %23, %cst_18 {dimension_numbers = #tpu.dot_dimension_numbers<[1], [0], [0], [1], [0, 0, 1, 1], [], []>} : vector<8x8xbf16>, vector<8x8xbf16>, vector<8x8xf32> -> vector<8x8xf32>
    %39 = vector.extract_strided_slice %16 {offsets = [0, 8], sizes = [8, 8], strides = [1, 1]} : vector<8x32xbf16> to vector<8x8xbf16>
    %40 = vector.extract_strided_slice %18 {offsets = [0, 8], sizes = [8, 8], strides = [1, 1]} : vector<8x32xbf16> to vector<8x8xbf16>
    %41 = vector.extract_strided_slice %20 {offsets = [0, 8], sizes = [8, 8], strides = [1, 1]} : vector<8x32xbf16> to vector<8x8xbf16>
    %cst_19 = arith.constant dense<0.000000e+00> : vector<8x8xf32>
    %42 = tpu.matmul %39, %40, %cst_19 {dimension_numbers = #tpu.dot_dimension_numbers<[1], [1], [0], [0], [0, 0, 1, 0], [], []>} : vector<8x8xbf16>, vector<8x8xbf16>, vector<8x8xf32> -> vector<8x8xf32>
    %cst_20 = arith.constant 0.353553385 : f32
    %43 = vector.broadcast %cst_20 : f32 to vector<8x8xf32>
    %44 = arith.mulf %42, %43 : vector<8x8xf32>
    %cst_21 = arith.constant dense<0xFF800000> : vector<8xf32>
    %45 = vector.multi_reduction <maximumf>, %44, %cst_21 [1] : vector<8x8xf32> to vector<8xf32>
    %46 = vector.shape_cast %45 : vector<8xf32> to vector<8x1xf32>
    %47 = vector.broadcast %46 : vector<8x1xf32> to vector<8x8xf32>
    %48 = arith.subf %44, %47 : vector<8x8xf32>
    %49 = math.exp %48 : vector<8x8xf32>
    %cst_22 = arith.constant dense<0.000000e+00> : vector<8xf32>
    %50 = vector.multi_reduction <add>, %49, %cst_22 [1] : vector<8x8xf32> to vector<8xf32>
    %51 = vector.shape_cast %50 : vector<8xf32> to vector<8x1xf32>
    %52 = tpu.reciprocal %51 {approx = true} : vector<8x1xf32> -> vector<8x1xf32>
    %53 = vector.broadcast %52 : vector<8x1xf32> to vector<8x8xf32>
    %54 = arith.mulf %49, %53 : vector<8x8xf32>
    %55 = arith.truncf %54 : vector<8x8xf32> to vector<8x8xbf16>
    %cst_23 = arith.constant dense<0.000000e+00> : vector<8x8xf32>
    %56 = tpu.matmul %55, %41, %cst_23 {dimension_numbers = #tpu.dot_dimension_numbers<[1], [0], [0], [1], [0, 0, 1, 1], [], []>} : vector<8x8xbf16>, vector<8x8xbf16>, vector<8x8xf32> -> vector<8x8xf32>
    %57 = vector.extract_strided_slice %16 {offsets = [0, 16], sizes = [8, 8], strides = [1, 1]} : vector<8x32xbf16> to vector<8x8xbf16>
    %58 = vector.extract_strided_slice %18 {offsets = [0, 16], sizes = [8, 8], strides = [1, 1]} : vector<8x32xbf16> to vector<8x8xbf16>
    %59 = vector.extract_strided_slice %20 {offsets = [0, 16], sizes = [8, 8], strides = [1, 1]} : vector<8x32xbf16> to vector<8x8xbf16>
    %cst_24 = arith.constant dense<0.000000e+00> : vector<8x8xf32>
    %60 = tpu.matmul %57, %58, %cst_24 {dimension_numbers = #tpu.dot_dimension_numbers<[1], [1], [0], [0], [0, 0, 1, 0], [], []>} : vector<8x8xbf16>, vector<8x8xbf16>, vector<8x8xf32> -> vector<8x8xf32>
    %cst_25 = arith.constant 0.353553385 : f32
    %61 = vector.broadcast %cst_25 : f32 to vector<8x8xf32>
    %62 = arith.mulf %60, %61 : vector<8x8xf32>
    %cst_26 = arith.constant dense<0xFF800000> : vector<8xf32>
    %63 = vector.multi_reduction <maximumf>, %62, %cst_26 [1] : vector<8x8xf32> to vector<8xf32>
    %64 = vector.shape_cast %63 : vector<8xf32> to vector<8x1xf32>
    %65 = vector.broadcast %64 : vector<8x1xf32> to vector<8x8xf32>
    %66 = arith.subf %62, %65 : vector<8x8xf32>
    %67 = math.exp %66 : vector<8x8xf32>
    %cst_27 = arith.constant dense<0.000000e+00> : vector<8xf32>
    %68 = vector.multi_reduction <add>, %67, %cst_27 [1] : vector<8x8xf32> to vector<8xf32>
    %69 = vector.shape_cast %68 : vector<8xf32> to vector<8x1xf32>
    %70 = tpu.reciprocal %69 {approx = true} : vector<8x1xf32> -> vector<8x1xf32>
    %71 = vector.broadcast %70 : vector<8x1xf32> to vector<8x8xf32>
    %72 = arith.mulf %67, %71 : vector<8x8xf32>
    %73 = arith.truncf %72 : vector<8x8xf32> to vector<8x8xbf16>
    %cst_28 = arith.constant dense<0.000000e+00> : vector<8x8xf32>
    %74 = tpu.matmul %73, %59, %cst_28 {dimension_numbers = #tpu.dot_dimension_numbers<[1], [0], [0], [1], [0, 0, 1, 1], [], []>} : vector<8x8xbf16>, vector<8x8xbf16>, vector<8x8xf32> -> vector<8x8xf32>
    %75 = vector.extract_strided_slice %16 {offsets = [0, 24], sizes = [8, 8], strides = [1, 1]} : vector<8x32xbf16> to vector<8x8xbf16>
    %76 = vector.extract_strided_slice %18 {offsets = [0, 24], sizes = [8, 8], strides = [1, 1]} : vector<8x32xbf16> to vector<8x8xbf16>
    %77 = vector.extract_strided_slice %20 {offsets = [0, 24], sizes = [8, 8], strides = [1, 1]} : vector<8x32xbf16> to vector<8x8xbf16>
    %cst_29 = arith.constant dense<0.000000e+00> : vector<8x8xf32>
    %78 = tpu.matmul %75, %76, %cst_29 {dimension_numbers = #tpu.dot_dimension_numbers<[1], [1], [0], [0], [0, 0, 1, 0], [], []>} : vector<8x8xbf16>, vector<8x8xbf16>, vector<8x8xf32> -> vector<8x8xf32>
    %cst_30 = arith.constant 0.353553385 : f32
    %79 = vector.broadcast %cst_30 : f32 to vector<8x8xf32>
    %80 = arith.mulf %78, %79 : vector<8x8xf32>
    %cst_31 = arith.constant dense<0xFF800000> : vector<8xf32>
    %81 = vector.multi_reduction <maximumf>, %80, %cst_31 [1] : vector<8x8xf32> to vector<8xf32>
    %82 = vector.shape_cast %81 : vector<8xf32> to vector<8x1xf32>
    %83 = vector.broadcast %82 : vector<8x1xf32> to vector<8x8xf32>
    %84 = arith.subf %80, %83 : vector<8x8xf32>
    %85 = math.exp %84 : vector<8x8xf32>
    %cst_32 = arith.constant dense<0.000000e+00> : vector<8xf32>
    %86 = vector.multi_reduction <add>, %85, %cst_32 [1] : vector<8x8xf32> to vector<8xf32>
    %87 = vector.shape_cast %86 : vector<8xf32> to vector<8x1xf32>
    %88 = tpu.reciprocal %87 {approx = true} : vector<8x1xf32> -> vector<8x1xf32>
    %89 = vector.broadcast %88 : vector<8x1xf32> to vector<8x8xf32>
    %90 = arith.mulf %85, %89 : vector<8x8xf32>
    %91 = arith.truncf %90 : vector<8x8xf32> to vector<8x8xbf16>
    %cst_33 = arith.constant dense<0.000000e+00> : vector<8x8xf32>
    %92 = tpu.matmul %91, %77, %cst_33 {dimension_numbers = #tpu.dot_dimension_numbers<[1], [0], [0], [1], [0, 0, 1, 1], [], []>} : vector<8x8xbf16>, vector<8x8xbf16>, vector<8x8xf32> -> vector<8x8xf32>
    %93 = tpu.concatenate %38, %56, %74, %92 in 1 : vector<8x8xf32>, vector<8x8xf32>, vector<8x8xf32>, vector<8x8xf32> -> vector<8x32xf32>
    %94 = arith.truncf %93 : vector<8x32xf32> to vector<8x32xbf16>
    %c0_34 = arith.constant 0 : index
    %c0_35 = arith.constant 0 : index
    %95 = vector.load %arg8[%c0_34, %c0_35] : memref<32x32xbf16, #tpu.memory_space<vmem>>, vector<32x32xbf16>
    %cst_36 = arith.constant dense<0.000000e+00> : vector<8x32xf32>
    %96 = tpu.matmul %94, %95, %cst_36 {dimension_numbers = #tpu.dot_dimension_numbers<[1], [0], [0], [1], [0, 0, 1, 1], [], []>} : vector<8x32xbf16>, vector<32x32xbf16>, vector<8x32xf32> -> vector<8x32xf32>
    %c0_37 = arith.constant 0 : index
    %c0_38 = arith.constant 0 : index
    %97 = vector.load %arg9[%c0_37, %c0_38] : memref<1x32xf32, #tpu.memory_space<vmem>>, vector<1x32xf32>
    %98 = vector.broadcast %97 : vector<1x32xf32> to vector<8x32xf32>
    %99 = arith.addf %96, %98 : vector<8x32xf32>
    %100 = arith.addf %1, %99 : vector<8x32xf32>
    %c0_39 = arith.constant 0 : index
    %c0_40 = arith.constant 0 : index
    %101 = vector.load %arg14[%c0_39, %c0_40] : memref<1x32xf32, #tpu.memory_space<vmem>>, vector<1x32xf32>
    %c0_41 = arith.constant 0 : index
    %c0_42 = arith.constant 0 : index
    %102 = vector.load %arg15[%c0_41, %c0_42] : memref<1x32xf32, #tpu.memory_space<vmem>>, vector<1x32xf32>
    %cst_43 = arith.constant dense<0.000000e+00> : vector<8xf32>
    %103 = vector.multi_reduction <add>, %100, %cst_43 [1] : vector<8x32xf32> to vector<8xf32>
    %104 = vector.shape_cast %103 : vector<8xf32> to vector<8x1xf32>
    %cst_44 = arith.constant 3.200000e+01 : f32
    %105 = vector.broadcast %cst_44 : f32 to vector<8x1xf32>
    %106 = arith.divf %104, %105 : vector<8x1xf32>
    %107 = vector.broadcast %106 : vector<8x1xf32> to vector<8x32xf32>
    %108 = arith.subf %100, %107 : vector<8x32xf32>
    %109 = arith.mulf %108, %108 : vector<8x32xf32>
    %cst_45 = arith.constant dense<0.000000e+00> : vector<8xf32>
    %110 = vector.multi_reduction <add>, %109, %cst_45 [1] : vector<8x32xf32> to vector<8xf32>
    %111 = vector.shape_cast %110 : vector<8xf32> to vector<8x1xf32>
    %cst_46 = arith.constant 3.200000e+01 : f32
    %112 = vector.broadcast %cst_46 : f32 to vector<8x1xf32>
    %113 = arith.divf %111, %112 : vector<8x1xf32>
    %cst_47 = arith.constant 9.99999996E-13 : f32
    %114 = vector.broadcast %cst_47 : f32 to vector<8x1xf32>
    %115 = arith.addf %113, %114 : vector<8x1xf32>
    %116 = math.rsqrt %115 : vector<8x1xf32>
    %117 = vector.broadcast %116 : vector<8x1xf32> to vector<8x32xf32>
    %118 = arith.mulf %108, %117 : vector<8x32xf32>
    %119 = vector.broadcast %101 : vector<1x32xf32> to vector<8x32xf32>
    %120 = arith.mulf %118, %119 : vector<8x32xf32>
    %121 = vector.broadcast %102 : vector<1x32xf32> to vector<8x32xf32>
    %122 = arith.addf %120, %121 : vector<8x32xf32>
    %123 = arith.truncf %122 : vector<8x32xf32> to vector<8x32xbf16>
    %c0_48 = arith.constant 0 : index
    %c0_49 = arith.constant 0 : index
    %124 = vector.load %arg10[%c0_48, %c0_49] : memref<32x128xbf16, #tpu.memory_space<vmem>>, vector<32x128xbf16>
    %cst_50 = arith.constant dense<0.000000e+00> : vector<8x128xf32>
    %125 = tpu.matmul %123, %124, %cst_50 {dimension_numbers = #tpu.dot_dimension_numbers<[1], [0], [0], [1], [0, 0, 1, 1], [], []>} : vector<8x32xbf16>, vector<32x128xbf16>, vector<8x128xf32> -> vector<8x128xf32>
    %c0_51 = arith.constant 0 : index
    %c0_52 = arith.constant 0 : index
    %126 = vector.load %arg11[%c0_51, %c0_52] : memref<1x128xf32, #tpu.memory_space<vmem>>, vector<1x128xf32>
    %127 = vector.broadcast %126 : vector<1x128xf32> to vector<8x128xf32>
    %128 = arith.addf %125, %127 : vector<8x128xf32>
    %cst_53 = arith.constant 5.000000e-01 : f32
    %129 = vector.broadcast %cst_53 : f32 to vector<8x128xf32>
    %130 = arith.mulf %129, %128 : vector<8x128xf32>
    %cst_54 = arith.constant 0.707106769 : f32
    %131 = vector.broadcast %cst_54 : f32 to vector<8x128xf32>
    %132 = arith.mulf %128, %131 : vector<8x128xf32>
    %cst_55 = arith.constant 0.000000e+00 : f32
    %133 = vector.broadcast %cst_55 : f32 to vector<8x128xf32>
    %134 = arith.cmpf oge, %132, %133 : vector<8x128xf32>
    %cst_56 = arith.constant 1.000000e+00 : f32
    %cst_57 = arith.constant -1.000000e+00 : f32
    %135 = vector.broadcast %cst_56 : f32 to vector<8x128xf32>
    %136 = vector.broadcast %cst_57 : f32 to vector<8x128xf32>
    %137 = arith.select %134, %135, %136 : vector<8x128xi1>, vector<8x128xf32>
    %138 = math.absf %132 : vector<8x128xf32>
    %cst_58 = arith.constant 0.327591091 : f32
    %139 = vector.broadcast %cst_58 : f32 to vector<8x128xf32>
    %140 = arith.mulf %139, %138 : vector<8x128xf32>
    %cst_59 = arith.constant 1.000000e+00 : f32
    %141 = vector.broadcast %cst_59 : f32 to vector<8x128xf32>
    %142 = arith.addf %141, %140 : vector<8x128xf32>
    %cst_60 = arith.constant 1.000000e+00 : f32
    %143 = vector.broadcast %cst_60 : f32 to vector<8x128xf32>
    %144 = arith.divf %143, %142 : vector<8x128xf32>
    %cst_61 = arith.constant 1.06140542 : f32
    %145 = vector.broadcast %cst_61 : f32 to vector<8x128xf32>
    %146 = arith.mulf %145, %144 : vector<8x128xf32>
    %cst_62 = arith.constant -1.45315206 : f32
    %147 = vector.broadcast %cst_62 : f32 to vector<8x128xf32>
    %148 = arith.addf %146, %147 : vector<8x128xf32>
    %149 = arith.mulf %148, %144 : vector<8x128xf32>
    %cst_63 = arith.constant 1.42141378 : f32
    %150 = vector.broadcast %cst_63 : f32 to vector<8x128xf32>
    %151 = arith.addf %149, %150 : vector<8x128xf32>
    %152 = arith.mulf %151, %144 : vector<8x128xf32>
    %cst_64 = arith.constant -0.284496725 : f32
    %153 = vector.broadcast %cst_64 : f32 to vector<8x128xf32>
    %154 = arith.addf %152, %153 : vector<8x128xf32>
    %155 = arith.mulf %154, %144 : vector<8x128xf32>
    %cst_65 = arith.constant 0.254829586 : f32
    %156 = vector.broadcast %cst_65 : f32 to vector<8x128xf32>
    %157 = arith.addf %155, %156 : vector<8x128xf32>
    %158 = arith.mulf %157, %144 : vector<8x128xf32>
    %cst_66 = arith.constant 0.000000e+00 : f32
    %159 = vector.broadcast %cst_66 : f32 to vector<8x128xf32>
    %160 = arith.subf %159, %138 : vector<8x128xf32>
    %161 = arith.mulf %160, %138 : vector<8x128xf32>
    %162 = math.exp %161 : vector<8x128xf32>
    %163 = arith.mulf %158, %162 : vector<8x128xf32>
    %cst_67 = arith.constant 1.000000e+00 : f32
    %164 = vector.broadcast %cst_67 : f32 to vector<8x128xf32>
    %165 = arith.subf %164, %163 : vector<8x128xf32>
    %166 = arith.mulf %137, %165 : vector<8x128xf32>
    %cst_68 = arith.constant 1.000000e+00 : f32
    %167 = vector.broadcast %cst_68 : f32 to vector<8x128xf32>
    %168 = arith.addf %167, %166 : vector<8x128xf32>
    %169 = arith.mulf %130, %168 : vector<8x128xf32>
    %170 = arith.truncf %169 : vector<8x128xf32> to vector<8x128xbf16>
    %c0_69 = arith.constant 0 : index
    %c0_70 = arith.constant 0 : index
    %171 = vector.load %arg12[%c0_69, %c0_70] : memref<128x32xbf16, #tpu.memory_space<vmem>>, vector<128x32xbf16>
    %cst_71 = arith.constant dense<0.000000e+00> : vector<8x32xf32>
    %172 = tpu.matmul %170, %171, %cst_71 {dimension_numbers = #tpu.dot_dimension_numbers<[1], [0], [0], [1], [0, 0, 1, 1], [], []>} : vector<8x128xbf16>, vector<128x32xbf16>, vector<8x32xf32> -> vector<8x32xf32>
    %c0_72 = arith.constant 0 : index
    %c0_73 = arith.constant 0 : index
    %173 = vector.load %arg13[%c0_72, %c0_73] : memref<1x32xf32, #tpu.memory_space<vmem>>, vector<1x32xf32>
    %174 = vector.broadcast %173 : vector<1x32xf32> to vector<8x32xf32>
    %175 = arith.addf %172, %174 : vector<8x32xf32>
    %176 = arith.addf %122, %175 : vector<8x32xf32>
    %c0_74 = arith.constant 0 : index
    %c0_75 = arith.constant 0 : index
    %177 = vector.load %arg16[%c0_74, %c0_75] : memref<1x32xf32, #tpu.memory_space<vmem>>, vector<1x32xf32>
    %c0_76 = arith.constant 0 : index
    %c0_77 = arith.constant 0 : index
    %178 = vector.load %arg17[%c0_76, %c0_77] : memref<1x32xf32, #tpu.memory_space<vmem>>, vector<1x32xf32>
    %cst_78 = arith.constant dense<0.000000e+00> : vector<8xf32>
    %179 = vector.multi_reduction <add>, %176, %cst_78 [1] : vector<8x32xf32> to vector<8xf32>
    %180 = vector.shape_cast %179 : vector<8xf32> to vector<8x1xf32>
    %cst_79 = arith.constant 3.200000e+01 : f32
    %181 = vector.broadcast %cst_79 : f32 to vector<8x1xf32>
    %182 = arith.divf %180, %181 : vector<8x1xf32>
    %183 = vector.broadcast %182 : vector<8x1xf32> to vector<8x32xf32>
    %184 = arith.subf %176, %183 : vector<8x32xf32>
    %185 = arith.mulf %184, %184 : vector<8x32xf32>
    %cst_80 = arith.constant dense<0.000000e+00> : vector<8xf32>
    %186 = vector.multi_reduction <add>, %185, %cst_80 [1] : vector<8x32xf32> to vector<8xf32>
    %187 = vector.shape_cast %186 : vector<8xf32> to vector<8x1xf32>
    %cst_81 = arith.constant 3.200000e+01 : f32
    %188 = vector.broadcast %cst_81 : f32 to vector<8x1xf32>
    %189 = arith.divf %187, %188 : vector<8x1xf32>
    %cst_82 = arith.constant 9.99999996E-13 : f32
    %190 = vector.broadcast %cst_82 : f32 to vector<8x1xf32>
    %191 = arith.addf %189, %190 : vector<8x1xf32>
    %192 = math.rsqrt %191 : vector<8x1xf32>
    %193 = vector.broadcast %192 : vector<8x1xf32> to vector<8x32xf32>
    %194 = arith.mulf %184, %193 : vector<8x32xf32>
    %195 = vector.broadcast %177 : vector<1x32xf32> to vector<8x32xf32>
    %196 = arith.mulf %194, %195 : vector<8x32xf32>
    %197 = vector.broadcast %178 : vector<1x32xf32> to vector<8x32xf32>
    %198 = arith.addf %196, %197 : vector<8x32xf32>
    %c0_83 = arith.constant 0 : index
    %c0_84 = arith.constant 0 : index
    %c0_85 = arith.constant 0 : index
    %199 = vector.load %arg18[%c0_83, %c0_84, %c0_85] : memref<1x8x32xf32, #tpu.memory_space<vmem>>, vector<1x8x32xf32>
    %200 = vector.shape_cast %199 : vector<1x8x32xf32> to vector<8x32xf32>
    %201 = vector.shape_cast %198 : vector<8x32xf32> to vector<1x8x32xf32>
    tpu.vector_store %arg18[%c0_83, %c0_84, %c0_85], %201 {strides = array<i32>} : memref<1x8x32xf32, #tpu.memory_space<vmem>>, vector<1x8x32xf32>,
    return
  }
  func.func @transform_0(%arg0: i32, %arg1: i32) -> (i32, i32, i32) {
    %c0_i32 = arith.constant 0 : i32
    %c0_i32_0 = arith.constant 0 : i32
    return %arg0, %arg1, %c0_i32 : i32, i32, i32
  }
  func.func @transform_1(%arg0: i32, %arg1: i32) -> (i32, i32, i32) {
    %c0_i32 = arith.constant 0 : i32
    %c0_i32_0 = arith.constant 0 : i32
    %c0_i32_1 = arith.constant 0 : i32
    return %arg0, %c0_i32, %c0_i32_0 : i32, i32, i32
  }
  func.func @transform_2(%arg0: i32, %arg1: i32) -> (i32, i32) {
    %c0_i32 = arith.constant 0 : i32
    %c0_i32_0 = arith.constant 0 : i32
    %c0_i32_1 = arith.constant 0 : i32
    return %c0_i32, %c0_i32_0 : i32, i32
  }
  func.func @transform_3(%arg0: i32, %arg1: i32) -> (i32, i32) {
    %c0_i32 = arith.constant 0 : i32
    %c0_i32_0 = arith.constant 0 : i32
    %c0_i32_1 = arith.constant 0 : i32
    return %c0_i32, %c0_i32_0 : i32, i32
  }
  func.func @transform_4(%arg0: i32, %arg1: i32) -> (i32, i32) {
    %c0_i32 = arith.constant 0 : i32
    %c0_i32_0 = arith.constant 0 : i32
    %c0_i32_1 = arith.constant 0 : i32
    return %c0_i32, %c0_i32_0 : i32, i32
  }
  func.func @transform_5(%arg0: i32, %arg1: i32) -> (i32, i32) {
    %c0_i32 = arith.constant 0 : i32
    %c0_i32_0 = arith.constant 0 : i32
    %c0_i32_1 = arith.constant 0 : i32
    return %c0_i32, %c0_i32_0 : i32, i32
  }
  func.func @transform_6(%arg0: i32, %arg1: i32) -> (i32, i32) {
    %c0_i32 = arith.constant 0 : i32
    %c0_i32_0 = arith.constant 0 : i32
    %c0_i32_1 = arith.constant 0 : i32
    return %c0_i32, %c0_i32_0 : i32, i32
  }
  func.func @transform_7(%arg0: i32, %arg1: i32) -> (i32, i32) {
    %c0_i32 = arith.constant 0 : i32
    %c0_i32_0 = arith.constant 0 : i32
    %c0_i32_1 = arith.constant 0 : i32
    return %c0_i32, %c0_i32_0 : i32, i32
  }
  func.func @transform_8(%arg0: i32, %arg1: i32) -> (i32, i32) {
    %c0_i32 = arith.constant 0 : i32
    %c0_i32_0 = arith.constant 0 : i32
    %c0_i32_1 = arith.constant 0 : i32
    return %c0_i32, %c0_i32_0 : i32, i32
  }
  func.func @transform_9(%arg0: i32, %arg1: i32) -> (i32, i32) {
    %c0_i32 = arith.constant 0 : i32
    %c0_i32_0 = arith.constant 0 : i32
    %c0_i32_1 = arith.constant 0 : i32
    return %c0_i32, %c0_i32_0 : i32, i32
  }
  func.func @transform_10(%arg0: i32, %arg1: i32) -> (i32, i32) {
    %c0_i32 = arith.constant 0 : i32
    %c0_i32_0 = arith.constant 0 : i32
    %c0_i32_1 = arith.constant 0 : i32
    return %c0_i32, %c0_i32_0 : i32, i32
  }
  func.func @transform_11(%arg0: i32, %arg1: i32) -> (i32, i32) {
    %c0_i32 = arith.constant 0 : i32
    %c0_i32_0 = arith.constant 0 : i32
    %c0_i32_1 = arith.constant 0 : i32
    return %c0_i32, %c0_i32_0 : i32, i32
  }
  func.func @transform_12(%arg0: i32, %arg1: i32) -> (i32, i32) {
    %c0_i32 = arith.constant 0 : i32
    %c0_i32_0 = arith.constant 0 : i32
    %c0_i32_1 = arith.constant 0 : i32
    return %c0_i32, %c0_i32_0 : i32, i32
  }
  func.func @transform_13(%arg0: i32, %arg1: i32) -> (i32, i32) {
    %c0_i32 = arith.constant 0 : i32
    %c0_i32_0 = arith.constant 0 : i32
    %c0_i32_1 = arith.constant 0 : i32
    return %c0_i32, %c0_i32_0 : i32, i32
  }
  func.func @transform_14(%arg0: i32, %arg1: i32) -> (i32, i32) {
    %c0_i32 = arith.constant 0 : i32
    %c0_i32_0 = arith.constant 0 : i32
    %c0_i32_1 = arith.constant 0 : i32
    return %c0_i32, %c0_i32_0 : i32, i32
  }
  func.func @transform_15(%arg0: i32, %arg1: i32) -> (i32, i32) {
    %c0_i32 = arith.constant 0 : i32
    %c0_i32_0 = arith.constant 0 : i32
    %c0_i32_1 = arith.constant 0 : i32
    return %c0_i32, %c0_i32_0 : i32, i32
  }
  func.func @transform_16(%arg0: i32, %arg1: i32) -> (i32, i32, i32) {
    %c0_i32 = arith.constant 0 : i32
    %c0_i32_0 = arith.constant 0 : i32
    return %arg0, %arg1, %c0_i32 : i32, i32, i32
  }
}

</mosaic_0001>

<bundles_post_ra>
// kernel: tpu_custom_call.1
= control target key start
LH: loop header
LB: loop body
LE: loop exit
PB: predicated region body
PF: predicated region fallthrough
CT: control target
= control target key end

     0   :  { %s2469_s0 = inlined_call_operand.vmem [shape: f32[2,8,32], index: 0, kind: input, shape index: {}]   ;;  %s2470_s1 = inlined_call_operand.vmem [shape: f32[2,8,32], index: 1, kind: input, shape index: {}]   ;;  %s2471_s2 = inlined_call_operand.vmem [shape: bf16[32,32], index: 2, kind: input, shape index: {}]   ;;  %s2472_s3 = inlined_call_operand.vmem [shape: f32[1,32], index: 3, kind: input, shape index: {}]   ;;  %s2473_s4 = inlined_call_operand.vmem [shape: bf16[32,64], index: 4, kind: input, shape index: {}]   ;;  %s2474_s5 = inlined_call_operand.vmem [shape: f32[1,64], index: 5, kind: input, shape index: {}]   ;;  %s2475_s6 = inlined_call_operand.vmem [shape: bf16[32,32], index: 6, kind: input, shape index: {}]   ;;  %s2476_s7 = inlined_call_operand.vmem [shape: f32[1,32], index: 7, kind: input, shape index: {}]   ;;  %s2477_s8 = inlined_call_operand.hbm [shape: bf16[32,128], index: 8, kind: input, shape index: {}]   ;;  %s2478_s9 = inlined_call_operand.vmem [shape: f32[1,128], index: 9, kind: input, shape index: {}]   ;;  %s2479_s10 = inlined_call_operand.vmem [shape: bf16[128,32], index: 10, kind: input, shape index: {}]   ;;  %s2480_s11 = inlined_call_operand.vmem [shape: f32[1,32], index: 11, kind: input, shape index: {}]   ;;  %s2481_s12 = inlined_call_operand.vmem [shape: f32[1,32], index: 12, kind: input, shape index: {}]   ;;  %s2482_s13 = inlined_call_operand.vmem [shape: f32[1,32], index: 13, kind: input, shape index: {}]   ;;  %s2483_s14 = inlined_call_operand.vmem [shape: f32[1,32], index: 14, kind: input, shape index: {}]   ;;  %s2484_s15 = inlined_call_operand.vmem [shape: f32[1,32], index: 15, kind: input, shape index: {}]   ;;  %s2485_s16 = inlined_call_operand.hbm [shape: f32[2,8,32], index: 16, kind: output, shape index: {}]  }
   0x1   :  { %2497 = sst [smem:[#allocation15_spill]] %s2469_s0 }
   0x2   :  { %21 = vsyncpa [#allocation3], 0 }
   0x3   :  { %22 = vsyncpa [#allocation4], 0 }
   0x4   :  { %24 = vsyncpa [#allocation4 + $0x1], 0  ;;  %s2143_s21 = smov 0   ;;  %s2145_s22 = smov 0  }
   0x5   :  { %s2147_s23 = smov 0   ;;  %s2149_s24 = smov 0  }
   0x6   :  { %s2151_s25 = smov 0   ;;  %s2153_s26 = smov 0  }
   0x7 LB: > { %2498 = sst [smem:[#allocation8_spill]] %s2019_s21  ;;  %s1620_s27 = sadd.s32 4294967295, %s2039_s26   ;;  %s2039_s26 = sphi %s2153_s26, %s30_s26   ;;  %s2035_s25 = sphi %s2151_s25, %s2521_s25   ;;  %s2031_s24 = sphi %s2149_s24, %s2520_s24   ;;  %s2027_s23 = sphi %s2147_s23, %s2519_s23   ;;  %s2023_s22 = sphi %s2145_s22, %s2523_s22   ;;  %s2019_s21 = sphi %s2143_s21, %s2522_s21  }
   0x8   : > { %2499 = sst [smem:[#allocation9_spill]] %s2027_s23  ;;  %s1621_s28 = sadd.s32 4294967294, %s2039_s26  }
   0x9   : > { %2500 = sst [smem:[#allocation10_spill]] %s2035_s25  ;;  %s42_s29 = sadd.s32 1, %s2035_s25 }
   0xa   : > { %2501 = sst [smem:[#allocation11_spill]] %s2039_s26  ;;  %s399_s30 = sadd.s32 1, %s2027_s23 }
   0xb   : > { %p44_p0 = scmp.ge.s32.totalorder %s42_s29, 2  ;;  %p409_p1 = scmp.ne.s32.totalorder %s2027_s23, %s2023_s22 }
   0xc   : > { %p410_p2 = scmp.eq.s32.totalorder %s1620_s27, 1  ;;  %p415_p3 = scmp.ne.s32.totalorder %s2023_s22, %s2019_s21 }
   0xd   : > { %s2525_s29 = smov (%p44_p0, %s42_s29), 0  ;;  %p416_p5 = scmp.eq.s32.totalorder %s1621_s28, 1 }
   0xe   : > { %2502 = sst [smem:[#allocation12_spill]] %s2525_s29  ;;  %p2183_p4 = por %p410_p2, %p409_p1 }
   0xf   : > { %s394_s17 = ssub.s32 %s2035_s25, %s2525_s29  ;;  %p1622_p6 = scmp.ge.s32.totalorder %s2039_s26, 1 }
  0x10   : > { %s2503_s0 = scalar_select %p2183_p4, 1, 0 }
  0x11   : > { %p397_p7 = scmp.eq.s32.totalorder %s394_s17, 0  ;;  %p2190_p8 = por %p416_p5, %p415_p3 }
  0x12   : > { %p423_p9 = scmp.lt.s32.totalorder %s2039_s26, 3  ;;  %p2202_p11 = scmp.eq.s32.totalorder %s1620_s27, 0 }
  0x13   : > { %s2504_s18 = scalar_select %p2190_p8, 1, 0 }
  0x14   : > { %s2196_s19 = scalar_select %p397_p7, %s2027_s23, %s399_s30  }
  0x15   : > { %2505 = sst [smem:[#allocation13_spill]] %s2504_s18  ;;  %p2198_p10 = pnand %p1622_p6, %p423_p9 }
  0x16   : > { %2506 = sst [smem:[#allocation14_spill]] %s2196_s19  ;;  %s2041_s28 = smov [#allocation2]  }
  0x17   : > { %s2507_s20 = scalar_select %p2198_p10, 1, 0 }
  0x18   : > { %s2508_s21 = scalar_select %p2202_p11, 1, 0 }
  0x19   : > { %p1814_p12 = pneg %p2198_p10  ;;  %s453_s17 = sshll.u32 %s2041_s28, 4  ;;  %s454_s17 = int_to_ptr.vmem [resolvable:$true] %s453_s17 }
  0x1a   : > { %s1929_s19 = scalar_lea.hbm %s2477_s8, 256 }
  0x1b   : > { %p2210_p13 = pnand %p2202_p11, %p1814_p12  ;;  %p1930_p0 = scmp.ne.s32.totalorder %s2477_s8, %s1929_s19 }
  0x1c   : > { %p1936_p5 = scmp.lt.u32.totalorder %s1929_s19, %s2477_s8 }
  0x1d   : > { %p1931_p1 = pneg %p2210_p13 }
  0x1f   : > { %p1932_p2 = pnand %p1931_p1, %p1930_p0 }
  0x21   : > { %p1933_p3 = pneg %p1932_p2 }
  0x23   : > { %p1938_p6 = pnand %p1936_p5, %p1933_p3 }
  0x25   : > { %1941 = shalt.err (!%p1938_p6)
}
  0x26   : > { %s1942_s26 = scalar_lea.vmem %s454_s17, 256  ;;  %p1950_p8 = scmp.lt.s32.totalorder %s454_s17, %s454_s17 }
  0x27   : > { %p1943_p7 = scmp.ne.s32.totalorder %s454_s17, %s1942_s26  ;;  %p1951_p4 = scmp.lt.s32.totalorder %s1942_s26, %s1942_s26 }
  0x29   : > { %p1945_p9 = pnand %p1943_p7, %p1931_p1  ;;  %p1952_p11 = por %p1951_p4, %p1950_p8 }
  0x2b   : > { %p1946_p12 = pneg %p1945_p9 }
  0x2d   : > { %p1953_p10 = pnand %p1952_p11, %p1946_p12 }
  0x2f   : > { %1956 = shalt.err (!%p1953_p10)
}
  0x30   : > { %s2042_s23 = smov 64   ;;  %s2043_s25 = smov 4  }
  0x31   : > { %1817 = dma.hbm_to_vmem [thread:$0]  (!%p2210_p13), %s2477_s8, 256, %s454_s17, [#allocation3], %s2042_s23, %s2042_s23, %s2043_s25  }
  0x32   : > { %p2510_p0 = scmp.ne.s32.totalorder %s2507_s20, 0 }
  0x33   : > { %p2511_p2 = scmp.ne.s32.totalorder (!%p2510_p0), %s2508_s21, 0 }
  0x34   : > { %507 = sbr.rel (%p2510_p0) target bundleno = 2639 (0xa4f), region = 84 }
  0x3b   : > { %2010 = dma.done.wait (%p2511_p2), [#allocation3], 256  }
  0x3c   : > { %2012 = vsyncadd (%p2511_p2), [#allocation3], 4294967040  ;;  %p563_p4 = scmp.lt.s32.totalorder %s2031_s24, 1  ;;  %v2044_v0 = vmov 0.0   ;;  %vm2045_vm0 = vmmov 0   ;;  %s2512_s19 = sld [smem:[#allocation15_spill]] }
  0x3d   : > { %1708 = vmatprep.subr.bf16.mxu1 %v2044_v0  ;;  %1712 = vmatprep.mubr.msk.bf16.mxu1 %vm2045_vm0, %v2044_v0  ;;  %v1889_v1 = vld [vmem:[%s2471_s2] sm:$0xff]   ;;  %v1890_v2 = vld [vmem:[%s2471_s2 + $0x8] sm:$0xff]   ;;  %vm601_vm1 = vcmask 261120   ;;  %vm714_vm2 = vcmask 64512   ;;  %s2046_s25 = smov 112   ;;  %s2047_s30 = smov 120  }
  0x3e   : > { %s564_s26 = scalar_select %p563_p4, %s2031_s24, 1  ;;  %1736 = vmatprep.subr.bf16.mxu0 %v2044_v0  ;;  %1738 = vmatprep.mubr.msk.bf16.mxu0 %vm2045_vm0, %v2044_v0  ;;  %v1891_v4 = vld [vmem:[%s2473_s4] sm:$0xff]   ;;  %v1892_v6 = vld [vmem:[%s2473_s4 + $0x8] sm:$0xff]   ;;  %vm780_vm3 = vcmask 1043456   ;;  %vm1171_vm4 = vcmask 130048   ;;  %vm1173_vm5 = vcmask 195584  }
  0x3f   : > { %1709 = vmatpush3.bf16.msra.mxu1 %v1889_v1  ;;  %v1634_v13 = vld [vmem:[%s2474_s5] ss:$0 sm:$0xff]  ;;  %s2048_s27 = smov 104   ;;  %s2050_s18 = smov 80  }
  0x40   : > { %s1628_s29 = sshll.u32 %s564_s26, 3  ;;  %1710 = vmatprep.subr.bf16.mxu1 %v2044_v0  ;;  %v1630_v14 = vld [vmem:[%s2472_s3] ss:$0 sm:$0xff]  ;;  %s2049_s26 = smov 96  }
  0x41   : > { %s573_s21 = scalar_lea.vmem %s2470_s1, %s1628_s29  ;;  %s2053_s17 = smov 8  }
  0x42   : > { %s569_s20 = scalar_lea.vmem %s2512_s19, %s1628_s29  ;;  %v576_v7 = vld [vmem:[%s573_s21] sm:$0xff]  ;;  %s2051_s21 = smov 72  }
  0x43   : > { %v2253_v3 = vld [vmem:[%s569_s20] sm:$0xff]  ;;  %1711 = vmatpush3.bf16.msra.mxu1 %v1890_v2  ;;  %v645_v8 = vpack.c.bf16 %v576_v7, %v576_v7  ;;  %s2052_s19 = smov 88   ;;  %s1668_s28 = sshll.u32 %s2031_s24, 7 }
  0x44   : > { %v577_v5 = vpack.c.bf16 %v2253_v3, %v2253_v3  ;;  %1716 = vmatprep.subr.bf16.mxu1 %v2044_v0  ;;  %p2513_p10 = scmp.ne.s32.totalorder %s2503_s0, 0  ;;  %s2057_s24 = smov [#allocation5]  }
  0x46   : > { %1713 = vmatmul.mubr.msk.bf16.vlgmr.msra.gmra.mrb[0].mxu1 %vm601_vm1, %v577_v5 }
  0x47   : > { %1717 = vmatpush3.bf16.msra.mxu1 %v1891_v4  ;;  %1720 = vmatprep.mubr.msk.bf16.mxu1 %vm2045_vm0, %v2044_v0 }
  0x48   : > { %1718 = vmatprep.subr.bf16.mxu1 %v2044_v0 }
  0x4b   : > { %1719 = vmatpush3.bf16.msra.mxu1 %v1892_v6 }
  0x4c   : > { %1724 = vmatprep.subr.bf16.mxu1 %v2044_v0 }
  0x4e   : > { %1721 = vmatmul.mubr.msk.bf16.vlgmr.msra.gmra.mrb[4].mxu1 %vm601_vm1, %v645_v8 }
  0x4f   : > { %1726 = vmatprep.mubr.msk.bf16.mxu1 %vm2045_vm0, %v2044_v0 }
 0x119   : > { %v639_v9 = vpop.f32.mrb[0].mxu1 }
 0x11a   : > { %v1714_v10 = vpop.f32.mrb[1].mxu1  ;;  %v640_v19 = vadd.f32 %v1630_v14, %v639_v9 }
 0x11b   : > { %v642_v11 = vpop.f32.mrb[2].mxu1 }
 0x11c   : > { %v1715_v12 = vpop.f32.mrb[3].mxu1  ;;  %v712_v23 = vpack.c.bf16 %v640_v19, %v640_v19 }
 0x121   : > { %v706_v15 = vpop.f32.mrb[4].mxu1 }
 0x122   : > { %v707_v16 = vadd.f32 %v1634_v13, %v706_v15  ;;  %v1722_v17 = vpop.f32.mrb[5].mxu1 }
 0x123   : > { %v709_v18 = vpop.f32.mrb[6].mxu1 }
 0x124   : > { %v2282_v20 = vpack.c.bf16 %v707_v16, %v707_v16  ;;  %v1723_v21 = vpop.f32.mrb[7].mxu1 }
 0x126   : > { %938 = vrot.lane.b32.xlu1 %v2282_v20, %s2046_s25  ;;  %827 = vrot.lane.b32.xlu0 %v2282_v20, %s2047_s30  ;;  %v719_v22 = vsel %vm714_vm2, %v2282_v20, 0 }
 0x127   : > { %1725 = vmatpush3.bf16.xpose.msra.mxu1 %v719_v22 }
 0x128   : > { %1730 = vmatprep.subr.bf16.mxu1 %v2044_v0 }
 0x12a   : > { %936 = vrot.lane.b32.xlu1 %v712_v23, %s2046_s25  ;;  %825 = vrot.lane.b32.xlu0 %v712_v23, %s2047_s30  ;;  %s2054_s25 = smov 16   ;;  %s2055_s30 = smov 24  }
 0x12e   : > { %1047 = vrot.lane.b32.xlu1 %v712_v23, %s2048_s27  ;;  %1049 = vrot.lane.b32.xlu0 %v2282_v20, %s2048_s27 }
 0x12f   : > { %1727 = vmatmul.mubr.msk.bf16.vlgmr.msra.gmra.mrb[8].mxu1 %vm714_vm2, %v712_v23 }
 0x130   : > { %1732 = vmatprep.mubr.msk.bf16.mxu1 %vm2045_vm0, %v2044_v0 }
 0x198   : > { %v828_v24 = vpop.permute.xlu0 %827  ;;  %v939_v26 = vpop.permute.xlu1 %938 }
 0x199   : > { %v833_v25 = vsel %vm714_vm2, %v828_v24, 0  ;;  %v944_v28 = vsel %vm714_vm2, %v939_v26, 0 }
 0x19a   : > { %1737 = vmatpush3.bf16.xpose.msra.mxu0 %v833_v25 }
 0x19b   : > { %1748 = vmatprep.subr.bf16.mxu0 %v2044_v0 }
 0x19c   : > { %v826_v27 = vpop.permute.xlu0 %825  ;;  %v937_v30 = vpop.permute.xlu1 %936 }
 0x1a0   : > { %v1050_v29 = vpop.permute.xlu0 %1049  ;;  %v1048_v32 = vpop.permute.xlu1 %1047 }
 0x1a1   : > { %1739 = vmatmul.mubr.msk.bf16.vlgmr.msra.gmra.mrb[0].mxu0 %vm714_vm2, %v826_v27  ;;  %v1055_v31 = vsel %vm714_vm2, %v1050_v29, 0 }
 0x1a2   : > { %1749 = vmatpush3.bf16.xpose.msra.mxu0 %v944_v28  ;;  %1750 = vmatprep.mubr.msk.bf16.mxu0 %vm2045_vm0, %v2044_v0 }
 0x1a3   : > { %1760 = vmatprep.subr.bf16.mxu0 %v2044_v0 }
 0x1a9   : > { %1751 = vmatmul.mubr.msk.bf16.vlgmr.msra.gmra.mrb[4].mxu0 %vm714_vm2, %v937_v30 }
 0x1aa   : > { %1761 = vmatpush3.bf16.xpose.msra.mxu0 %v1055_v31  ;;  %1762 = vmatprep.mubr.msk.bf16.mxu0 %vm2045_vm0, %v2044_v0 }
 0x1ab   : > { %1772 = vmatprep.subr.bf16.mxu0 %v2044_v0 }
 0x1b1   : > { %1763 = vmatmul.mubr.msk.bf16.vlgmr.msra.gmra.mrb[8].mxu0 %vm714_vm2, %v1048_v32 }
 0x1b2   : > { %1776 = vmatprep.mubr.msk.bf16.mxu0 %vm2045_vm0, %v2044_v0 }
 0x202   : > { %v755_v33 = vpop.f32.mrb[8].mxu1 }
 0x203   : > { %v761_v34 = vmul.f32 0.35355338, %v755_v33  ;;  %v1728_v35 = vpop.f32.mrb[9].mxu1 }
 0x204   : > { %v758_v36 = vpop.f32.mrb[10].mxu1 }
 0x205   : > { %v1729_v37 = vpop.f32.mrb[11].mxu1  ;;  %v762_v38 = vsel %vm714_vm2, %v761_v34, -inf }
 0x206   : > { %763 = vmax.xlane.f32.xlu0 %v762_v38 }
 0x274   : > { %v869_v39 = vpop.f32.mrb[0].mxu0 }
 0x275   : > { %v875_v40 = vmul.f32 0.35355338, %v869_v39  ;;  %v1740_v41 = vpop.f32.mrb[1].mxu0 }
 0x276   : > { %v872_v42 = vpop.f32.mrb[2].mxu0 }
 0x277   : > { %v1741_v43 = vpop.f32.mrb[3].mxu0  ;;  %v876_v44 = vsel %vm714_vm2, %v875_v40, -inf }
 0x278   : > { %877 = vmax.xlane.f32.xlu1 %v876_v44  ;;  %v1893_v43 = vld [vmem:[%s2475_s6] sm:$0xff]  }
 0x279   : > { %1773 = vmatpush3.bf16.msra.mxu0 %v1893_v43 }
 0x27a   : > { %1774 = vmatprep.subr.bf16.mxu0 %v2044_v0 }
 0x27c   : > { %v980_v45 = vpop.f32.mrb[4].mxu0 }
 0x27d   : > { %v986_v46 = vmul.f32 0.35355338, %v980_v45  ;;  %v1752_v47 = vpop.f32.mrb[5].mxu0 }
 0x27e   : > { %v983_v48 = vpop.f32.mrb[6].mxu0 }
 0x27f   : > { %v1753_v49 = vpop.f32.mrb[7].mxu0  ;;  %v987_v50 = vsel %vm714_vm2, %v986_v46, -inf  ;;  %v1894_v48 = vld [vmem:[%s2475_s6 + $0x8] sm:$0xff]  }
 0x280   : > { %988 = vmax.xlane.f32.xlu0 %v987_v50  ;;  %1775 = vmatpush3.bf16.msra.mxu0 %v1894_v48 }
 0x281   : > { %1788 = vmatprep.subr.bf16.mxu0 %v2044_v0 }
 0x284   : > { %v1091_v51 = vpop.f32.mrb[8].mxu0 }
 0x285   : > { %v1097_v52 = vmul.f32 0.35355338, %v1091_v51  ;;  %v1764_v53 = vpop.f32.mrb[9].mxu0 }
 0x286   : > { %v1094_v54 = vpop.f32.mrb[10].mxu0 }
 0x287   : > { %v1765_v55 = vpop.f32.mrb[11].mxu0  ;;  %v1098_v56 = vsel %vm714_vm2, %v1097_v52, -inf }
 0x288   : > { %1099 = vmax.xlane.f32.xlu0 %v1098_v56 }
 0x293   : > { %v764_v57 = vpop.xlane.xlu0 %763 }
 0x294   : > { %v765_v58 = vsub.f32 %v761_v34, %v764_v57 }
 0x296   : > { %v766_v59 = vmul.f32 1.442695, %v765_v58 }
 0x298   : > { %1905 = vpow2.f32 %v766_v59 }
 0x2a2   : > { %v1906_v60 = vpop.eup %1905 }
 0x2a3   : > { %v768_v61 = vsel %vm714_vm2, %v1906_v60, 0.0 }
 0x2a4   : > { %769 = vadd.xlane.f32.xlu1 %v768_v61 }
 0x2b5   : > { %775 = vrot.lane.b32.xlu1 %v2282_v20, %s2049_s26  ;;  %s2421_s26 = scalar_lea.hbm %s2485_s16, %s1668_s28 }
 0x305   : > { %v878_v62 = vpop.xlane.xlu1 %877 }
 0x306   : > { %v879_v63 = vsub.f32 %v875_v40, %v878_v62 }
 0x308   : > { %v880_v1 = vmul.f32 1.442695, %v879_v63 }
 0x30a   : > { %1907 = vpow2.f32 %v880_v1  ;;  %v1646_v1 = vld [vmem:[%s2476_s7] ss:$0 sm:$0xff] }
 0x30d   : > { %v989_v2 = vpop.xlane.xlu0 %988 }
 0x30e   : > { %v990_v4 = vsub.f32 %v986_v46, %v989_v2 }
 0x310   : > { %v991_v5 = vmul.f32 1.442695, %v990_v4 }
 0x312   : > { %1909 = vpow2.f32 %v991_v5 }
 0x314   : > { %v1908_v6 = vpop.eup %1907 }
 0x315   : > { %v1100_v7 = vpop.xlane.xlu0 %1099  ;;  %v882_v8 = vsel %vm714_vm2, %v1908_v6, 0.0 }
 0x316   : > { %v1101_v9 = vsub.f32 %v1097_v52, %v1100_v7  ;;  %883 = vadd.xlane.f32.xlu0 %v882_v8 }
 0x318   : > { %v1102_v10 = vmul.f32 1.442695, %v1101_v9 }
 0x31a   : > { %1911 = vpow2.f32 %v1102_v10 }
 0x31c   : > { %v1910_v11 = vpop.eup %1909 }
 0x31d   : > { %v993_v12 = vsel %vm714_vm2, %v1910_v11, 0.0 }
 0x31e   : > { %994 = vadd.xlane.f32.xlu1 %v993_v12 }
 0x324   : > { %v1912_v13 = vpop.eup %1911 }
 0x325   : > { %v1104_v14 = vsel %vm714_vm2, %v1912_v13, 0.0 }
 0x326   : > { %1105 = vadd.xlane.f32.xlu0 %v1104_v14 }
 0x32f   : > { %999 = vrot.lane.b32.xlu1 %v2282_v20, %s2050_s18  ;;  %s560_s18 = sand.u32 1, %s2023_s22  }
 0x331   : > { %v770_v15 = vpop.xlane.xlu1 %769 }
 0x332   : > { %1913 = vrcp.f32 %v770_v15  ;;  %v1895_v15 = vld [vmem:[#allocation2] sm:$0xff]  }
 0x333   : > { %1110 = vrot.lane.b32.xlu1 %v2282_v20, %s2051_s21  ;;  %s1627_s21 = sshll.u32 %s560_s18, 3 }
 0x334   : > { %s562_s23 = scalar_lea.vmem [#allocation5], %s1627_s21  ;;  %s1961_s21 = sshll.u32 %s2057_s24, 4  ;;  %s1962_s21 = int_to_ptr.vmem [resolvable:$false] %s1961_s21 }
 0x335   : > { %v776_v16 = vpop.permute.xlu1 %775  ;;  %s1963_s29 = scalar_lea.vmem %s1962_s21, 256 }
 0x336   : > { %v782_v17 = vsel %vm780_vm3, %v776_v16, 0  ;;  %v1896_v16 = vld [vmem:[#allocation2 + $0x8] sm:$0xff]  }
 0x337   : > { %1731 = vmatpush3.bf16.msra.mxu1 %v782_v17 }
 0x338   : > { %1742 = vmatprep.subr.bf16.mxu1 %v2044_v0 }
 0x33c   : > { %v1914_v18 = vpop.eup %1913  ;;  %888 = vrot.lane.b32.xlu0 %v2282_v20, %s2052_s19  ;;  %s1511_s19 = scalar_lea.sflag [#allocation4], %s560_s18 }
 0x33d   : > { %v772_v19 = vmul.f32 %v1914_v18, %v1906_v60 }
 0x33f   : > { %v773_v21 = vpack.c.bf16 %v772_v19, %v772_v19 }
 0x341   : > { %1733 = vmatmul.mubr.msk.bf16.vlgmr.msra.gmra.mrb[12].mxu1 %vm714_vm2, %v773_v21  ;;  %v1650_v21 = vld [vmem:[%s2481_s12] ss:$0 sm:$0xff] }
 0x342   : > { %1744 = vmatprep.mubr.msk.bf16.mxu1 %vm2045_vm0, %v2044_v0 }
 0x3a3   : > { %v884_v22 = vpop.xlane.xlu0 %883 }
 0x3a4   : > { %1915 = vrcp.f32 %v884_v22 }
 0x3ab   : > { %v995_v23 = vpop.xlane.xlu1 %994 }
 0x3ac   : > { %1917 = vrcp.f32 %v995_v23  ;;  %v1651_v23 = vld [vmem:[%s2482_s13] ss:$0 sm:$0xff] }
 0x3ae   : > { %v1916_v24 = vpop.eup %1915 }
 0x3af   : > { %v886_v26 = vmul.f32 %v1916_v24, %v1908_v6  ;;  %v1000_v29 = vpop.permute.xlu1 %999 }
 0x3b0   : > { %v1005_v31 = vsel %vm780_vm3, %v1000_v29, 0  ;;  %v1899_v29 = vld [vmem:[%s2479_s10 + $0x10] sm:$0xff]  }
 0x3b1   : > { %v887_v20 = vpack.c.bf16 %v886_v26, %v886_v26 }
 0x3b3   : > { %v1106_v25 = vpop.xlane.xlu0 %1105  ;;  %v1111_v33 = vpop.permute.xlu1 %1110 }
 0x3b4   : > { %1919 = vrcp.f32 %v1106_v25  ;;  %v1116_v36 = vsel %vm780_vm3, %v1111_v33, 0  ;;  %v1904_v33 = vld [vmem:[%s2479_s10 + $0x38] sm:$0xff]  }
 0x3b6   : > { %v1918_v30 = vpop.eup %1917 }
 0x3b7   : > { %v889_v27 = vpop.permute.xlu0 %888  ;;  %v997_v32 = vmul.f32 %v1918_v30, %v1910_v11  ;;  %v1901_v30 = vld [vmem:[%s2479_s10 + $0x20] sm:$0xff]  }
 0x3b8   : > { %v894_v28 = vsel %vm780_vm3, %v889_v27, 0  ;;  %v1897_v27 = vld [vmem:[%s2479_s10] sm:$0xff]  }
 0x3b9   : > { %1743 = vmatpush3.bf16.msra.mxu1 %v894_v28  ;;  %v998_v34 = vpack.c.bf16 %v997_v32, %v997_v32  ;;  %v1898_v28 = vld [vmem:[%s2479_s10 + $0x8] sm:$0xff]   ;;  %v1903_v32 = vld [vmem:[%s2479_s10 + $0x30] sm:$0xff]  }
 0x3ba   : > { %1754 = vmatprep.subr.bf16.mxu1 %v2044_v0 }
 0x3bc   : > { %1745 = vmatmul.mubr.msk.bf16.vlgmr.msra.gmra.mrb[16].mxu1 %vm714_vm2, %v887_v20  ;;  %v1900_v20 = vld [vmem:[%s2479_s10 + $0x18] sm:$0xff]  }
 0x3bd   : > { %1755 = vmatpush3.bf16.msra.mxu1 %v1005_v31  ;;  %1756 = vmatprep.mubr.msk.bf16.mxu1 %vm2045_vm0, %v2044_v0  ;;  %v1902_v31 = vld [vmem:[%s2479_s10 + $0x28] sm:$0xff]  }
 0x3be   : > { %1766 = vmatprep.subr.bf16.mxu1 %v2044_v0  ;;  %v1920_v35 = vpop.eup %1919 }
 0x3bf   : > { %v1108_v37 = vmul.f32 %v1920_v35, %v1912_v13 }
 0x3c1   : > { %v1109_v38 = vpack.c.bf16 %v1108_v37, %v1108_v37 }
 0x3c4   : > { %1757 = vmatmul.mubr.msk.bf16.vlgmr.msra.gmra.mrb[20].mxu1 %vm714_vm2, %v998_v34  ;;  %v1652_v34 = vld [vmem:[%s2478_s9] ss:$0 sm:$0xff] }
 0x3c5   : > { %1767 = vmatpush3.bf16.msra.mxu1 %v1116_v36  ;;  %1768 = vmatprep.mubr.msk.bf16.mxu1 %vm2045_vm0, %v2044_v0 }
 0x3c6   : > { %1780 = vmatprep.subr.bf16.mxu1 %v2044_v0 }
 0x3cc   : > { %1769 = vmatmul.mubr.msk.bf16.vlgmr.msra.gmra.mrb[24].mxu1 %vm714_vm2, %v1109_v38 }
 0x3cd   : > { %1784 = vmatprep.mubr.msk.bf16.mxu1 %vm2045_vm0, %v2044_v0  ;;  %1781 = vmatpush3.bf16.msra.mxu1 %v1895_v15 }
 0x3ce   : > { %1782 = vmatprep.subr.bf16.mxu1 %v2044_v0 }
 0x3d1   : > { %1783 = vmatpush3.bf16.msra.mxu1 %v1896_v16 }
 0x414   : > { %v818_v39 = vpop.f32.mrb[12].mxu1 }
 0x415   : > { %v1734_v40 = vpop.f32.mrb[13].mxu1 }
 0x416   : > { %v821_v41 = vpop.f32.mrb[14].mxu1 }
 0x417   : > { %v1735_v42 = vpop.f32.mrb[15].mxu1 }
 0x48f   : > { %v930_v44 = vpop.f32.mrb[16].mxu1 }
 0x490   : > { %1159 = vrot.lane.b32.xlu0 %v930_v44, %s2053_s17  ;;  %v1746_v45 = vpop.f32.mrb[17].mxu1 }
 0x491   : > { %v933_v46 = vpop.f32.mrb[18].mxu1 }
 0x492   : > { %v1747_v47 = vpop.f32.mrb[19].mxu1 }
 0x497   : > { %v1041_v49 = vpop.f32.mrb[20].mxu1 }
 0x498   : > { %1163 = vrot.lane.b32.xlu1 %v1041_v49, %s2054_s25  ;;  %v1758_v50 = vpop.f32.mrb[21].mxu1  ;;  %s1525_s25 = sshll.u32 %s562_s23, 4  ;;  %s2423_s25 = int_to_ptr.vmem [resolvable:$true] %s1525_s25 }
 0x499   : > { %v1044_v51 = vpop.f32.mrb[22].mxu1  ;;  %s1957_s20 = scalar_lea.vmem %s2423_s25, 128  ;;  %p1964_p1 = scmp.lt.s32.totalorder %s2423_s25, %s1962_s21 }
 0x49a   : > { %v1759_v52 = vpop.f32.mrb[23].mxu1  ;;  %p1958_p8 = scmp.ne.s32.totalorder %s2423_s25, %s1957_s20  ;;  %p1965_p3 = scmp.lt.s32.totalorder %s1963_s29, %s1957_s20 }
 0x49c   : > { %p1959_p11 = pnand %p1958_p8, %p2513_p10  ;;  %p1966_p5 = por %p1965_p3, %p1964_p1 }
 0x49e   : > { %p1960_p13 = pneg %p1959_p11 }
 0x49f   : > { %v1152_v53 = vpop.f32.mrb[24].mxu1 }
 0x4a0   : > { %1167 = vrot.lane.b32.xlu0 %v1152_v53, %s2055_s30  ;;  %v1770_v54 = vpop.f32.mrb[25].mxu1  ;;  %p1967_p6 = pnand %p1966_p5, %p1960_p13 }
 0x4a1   : > { %v1155_v55 = vpop.f32.mrb[26].mxu1 }
 0x4a2   : > { %v1771_v56 = vpop.f32.mrb[27].mxu1 }
 0x502   : > { %v1160_v57 = vpop.permute.xlu0 %1159 }
 0x503   : > { %v1170_v59 = vsel %vm714_vm2, %v818_v39, %v1160_v57 }
 0x50a   : > { %v1164_v58 = vpop.permute.xlu1 %1163 }
 0x50b   : > { %v1172_v60 = vsel %vm1171_vm4, %v1170_v59, %v1164_v58  ;;  %v2056_v59 = vmov -1.0  }
 0x512   : > { %v1168_v61 = vpop.permute.xlu0 %1167 }
 0x513   : > { %v1174_v62 = vsel %vm1173_vm5, %v1172_v60, %v1168_v61 }
 0x514   : > { %v1175_v63 = vpack.c.bf16 %v1174_v62, %v1174_v62 }
 0x516   : > { %1777 = vmatmul.mubr.msk.bf16.vlgmr.msra.gmra.mrb[12].mxu0 %vm601_vm1, %v1175_v63 }
 0x517   : > { %1804 = vmatprep.mubr.msk.bf16.mxu0 %vm2045_vm0, %v2044_v0  ;;  %1789 = vmatpush3.bf16.msra.mxu0 %v1897_v27 }
 0x518   : > { %1790 = vmatprep.subr.bf16.mxu0 %v2044_v0 }
 0x51b   : > { %1791 = vmatpush3.bf16.msra.mxu0 %v1898_v28 }
 0x51c   : > { %1792 = vmatprep.subr.bf16.mxu0 %v2044_v0 }
 0x51f   : > { %1793 = vmatpush3.bf16.msra.mxu0 %v1899_v29 }
 0x520   : > { %1794 = vmatprep.subr.bf16.mxu0 %v2044_v0 }
 0x523   : > { %1795 = vmatpush3.bf16.msra.mxu0 %v1900_v20 }
 0x524   : > { %1796 = vmatprep.subr.bf16.mxu0 %v2044_v0 }
 0x527   : > { %1797 = vmatpush3.bf16.msra.mxu0 %v1901_v30 }
 0x528   : > { %1798 = vmatprep.subr.bf16.mxu0 %v2044_v0 }
 0x52b   : > { %1799 = vmatpush3.bf16.msra.mxu0 %v1902_v31 }
 0x52c   : > { %1800 = vmatprep.subr.bf16.mxu0 %v2044_v0 }
 0x52f   : > { %1801 = vmatpush3.bf16.msra.mxu0 %v1903_v32 }
 0x530   : > { %1802 = vmatprep.subr.bf16.mxu0 %v2044_v0 }
 0x533   : > { %1803 = vmatpush3.bf16.msra.mxu0 %v1904_v33 }
 0x5e9   : > { %v1236_v2 = vpop.f32.mrb[12].mxu0 }
 0x5ea   : > { %v1237_v4 = vadd.f32 %v1646_v1, %v1236_v2  ;;  %v1778_v5 = vpop.f32.mrb[13].mxu0 }
 0x5eb   : > { %v1239_v6 = vpop.f32.mrb[14].mxu0 }
 0x5ec   : > { %v1779_v7 = vpop.f32.mrb[15].mxu0  ;;  %v1242_v8 = vadd.f32 %v1237_v4, %v2253_v3  ;;  %v1656_v4 = vld [vmem:[%s2480_s11] ss:$0 sm:$0xff] }
 0x5ee   : > { %v1245_v9 = vsel %vm601_vm1, %v1242_v8, 0.0 }
 0x5ef   : > { %1246 = vadd.xlane.f32.xlu1 %v1245_v9 }
 0x67c   : > { %v1247_v10 = vpop.xlane.xlu1 %1246 }
 0x67d   : > { %v1249_v11 = vmul.f32 0.03125, %v1247_v10 }
 0x67f   : > { %v1250_v12 = vsub.f32 %v1242_v8, %v1249_v11 }
 0x681   : > { %v1251_v13 = vmul.f32 %v1250_v12, %v1250_v12 }
 0x683   : > { %v1252_v14 = vsel %vm601_vm1, %v1251_v13, 0.0 }
 0x684   : > { %1253 = vadd.xlane.f32.xlu0 %v1252_v14 }
 0x711   : > { %v1254_v17 = vpop.xlane.xlu0 %1253 }
 0x712   : > { %v1255_v18 = vmul.f32 0.03125, %v1254_v17 }
 0x714   : > { %v1256_v19 = vadd.f32 1e-12, %v1255_v18 }
 0x716   : > { %1921 = vrsqrt.f32 %v1256_v19 }
 0x720   : > { %v1922_v3 = vpop.eup %1921 }
 0x721   : > { %v1258_v22 = vmul.f32 %v1922_v3, %v1250_v12 }
 0x723   : > { %v1265_v24 = vmul.f32 %v1650_v21, %v1258_v22  ;;  %v1665_v21 = vld [vmem:[%s2483_s14] ss:$0 sm:$0xff] }
 0x725   : > { %v2365_v25 = vadd.f32 %v1651_v23, %v1265_v24  ;;  %v1666_v23 = vld [vmem:[%s2484_s15] ss:$0 sm:$0xff] }
 0x727   : > { %v1273_v26 = vpack.c.bf16 %v2365_v25, %v2365_v25 }
 0x729   : > { %1785 = vmatmul.mubr.msk.bf16.vlgmr.msra.gmra.mrb[28].mxu1 %vm601_vm1, %v1273_v26 }
 0x7fc   : > { %v1334_v35 = vpop.f32.mrb[28].mxu1 }
 0x7fd   : > { %v1335_v36 = vadd.f32 %v1652_v34, %v1334_v35  ;;  %v1786_v37 = vpop.f32.mrb[29].mxu1 }
 0x7fe   : > { %v1337_v38 = vpop.f32.mrb[30].mxu1 }
 0x7ff   : > { %v1341_v39 = vmul.f32 0.70710677, %v1335_v36  ;;  %v1787_v40 = vpop.f32.mrb[31].mxu1  ;;  %v1340_v62 = vmul.f32 0.5, %v1335_v36 }
 0x801   : > { %v1344_v41 = vand.u32 2147483647, %v1341_v39  ;;  %vm1342_vm6 = vcmp.ge.f32.partialorder %v1341_v39, 0.0 }
 0x802   : > { %v1343_v60 = vsel %vm1342_vm6, 1.0, %v2056_v59 }
 0x803   : > { %v1345_v42 = vmul.f32 0.3275911, %v1344_v41  ;;  %v1358_v0 = vsub.f32 0.0, %v1344_v41 }
 0x805   : > { %v1346_v43 = vadd.f32 1.0, %v1345_v42  ;;  %v1359_v45 = vmul.f32 %v1358_v0, %v1344_v41 }
 0x807   : > { %1923 = vrcp.f32 %v1346_v43  ;;  %v1360_v48 = vmul.f32 1.442695, %v1359_v45 }
 0x809   : > { %1925 = vpow2.f32 %v1360_v48 }
 0x811   : > { %v1924_v44 = vpop.eup %1923 }
 0x812   : > { %v1349_v46 = vmul.f32 1.0614054, %v1924_v44 }
 0x813   : > { %v1926_v56 = vpop.eup %1925 }
 0x814   : > { %v1350_v47 = vadd.f32 -1.4531521, %v1349_v46 }
 0x816   : > { %v1351_v49 = vmul.f32 %v1924_v44, %v1350_v47 }
 0x818   : > { %v1352_v50 = vadd.f32 1.4214138, %v1351_v49 }
 0x81a   : > { %v1353_v51 = vmul.f32 %v1924_v44, %v1352_v50 }
 0x81c   : > { %v1354_v52 = vadd.f32 -0.28449672, %v1353_v51 }
 0x81e   : > { %v1355_v53 = vmul.f32 %v1924_v44, %v1354_v52 }
 0x820   : > { %v1356_v54 = vadd.f32 0.2548296, %v1355_v53 }
 0x822   : > { %v1357_v55 = vmul.f32 %v1924_v44, %v1356_v54 }
 0x824   : > { %v1362_v57 = vmul.f32 %v1926_v56, %v1357_v55 }
 0x826   : > { %v1363_v58 = vsub.f32 1.0, %v1362_v57 }
 0x828   : > { %v1364_v61 = vmul.f32 %v1363_v58, %v1343_v60 }
 0x82a   : > { %v1365_v63 = vadd.f32 1.0, %v1364_v61 }
 0x82c   : > { %v1366_v1 = vmul.f32 %v1365_v63, %v1340_v62 }
 0x82e   : > { %v1367_v2 = vpack.c.bf16 %v1366_v1, %v1366_v1 }
 0x830   : > { %1805 = vmatmul.mubr.bf16.vlgmr.msra.gmra.mrb[16].mxu0 %v1367_v2 }
 0x903   : > { %v1473_v5 = vpop.f32.mrb[16].mxu0 }
 0x904   : > { %v1474_v6 = vadd.f32 %v1656_v4, %v1473_v5  ;;  %v1806_v7 = vpop.f32.mrb[17].mxu0 }
 0x905   : > { %v1476_v8 = vpop.f32.mrb[18].mxu0 }
 0x906   : > { %v1807_v9 = vpop.f32.mrb[19].mxu0  ;;  %v1479_v10 = vadd.f32 %v1474_v6, %v2365_v25 }
 0x908   : > { %v1482_v11 = vsel %vm601_vm1, %v1479_v10, 0.0 }
 0x909   : > { %1483 = vadd.xlane.f32.xlu0 %v1482_v11 }
 0x996   : > { %v1484_v12 = vpop.xlane.xlu0 %1483 }
 0x997   : > { %v1485_v13 = vmul.f32 0.03125, %v1484_v12 }
 0x999   : > { %v1486_v14 = vsub.f32 %v1479_v10, %v1485_v13 }
 0x99b   : > { %v1487_v15 = vmul.f32 %v1486_v14, %v1486_v14 }
 0x99d   : > { %v1488_v16 = vsel %vm601_vm1, %v1487_v15, 0.0 }
 0x99e   : > { %1489 = vadd.xlane.f32.xlu1 %v1488_v16 }
 0xa2b   : > { %v1490_v17 = vpop.xlane.xlu1 %1489 }
 0xa2c   : > { %v1491_v18 = vmul.f32 0.03125, %v1490_v17 }
 0xa2e   : > { %v1492_v19 = vadd.f32 1e-12, %v1491_v18 }
 0xa30   : > { %1927 = vrsqrt.f32 %v1492_v19 }
 0xa3a   : > { %v1928_v3 = vpop.eup %1927 }
 0xa3b   : > { %v1494_v22 = vmul.f32 %v1928_v3, %v1486_v14 }
 0xa3d   : > { %v1501_v24 = vmul.f32 %v1665_v21, %v1494_v22 }
 0xa3f   : > { %v1508_v25 = vadd.f32 %v1666_v23, %v1501_v24 }
 0xa41   : > { %1509 = vst.msk [vmem:[%s562_s23] sm:$0xff] %vm601_vm1, %v1508_v25 }
 0xa42   : > { %1970 = shalt.err (!%p1967_p6)
}
 0xa43   : > { %s1971_s18 = scalar_lea.hbm %s2421_s26, 128  ;;  %s1975_s23 = scalar_lea.hbm %s2485_s16, 256 }
 0xa44   : > { %p1972_p7 = scmp.ne.s32.totalorder %s2421_s26, %s1971_s18  ;;  %p1976_p0 = scmp.lt.u32.totalorder %s2421_s26, %s2485_s16 }
 0xa45   : > { %p1977_p2 = scmp.lt.u32.totalorder %s1975_s23, %s1971_s18  ;;  %p1979_p8 = scmp.lt.u32.totalorder %s1971_s18, %s2421_s26 }
 0xa46   : > { %p1973_p9 = pnand %p1972_p7, %p2513_p10 }
 0xa47   : > { %p1978_p4 = por %p1977_p2, %p1976_p0 }
 0xa48   : > { %p1974_p12 = pneg %p1973_p9 }
 0xa49   : > { %p1980_p11 = por %p1979_p8, %p1978_p4 }
 0xa4b   : > { %p1981_p13 = pnand %p1980_p11, %p1974_p12 }
 0xa4d   : > { %1984 = shalt.err (!%p1981_p13)
}
 0xa4e   : > { %1812 = dma.vmem_to_hbm [thread:$0]  (%p2513_p10), %s2423_s25, 128, %s2421_s26, %s1511_s19  }
 0xa4f PF: > { %s2514_s20 = sld [smem:[#allocation11_spill]]  ;;  %s2515_s24 = sld [smem:[#allocation8_spill]] }
 0xa50   : > { %s2516_s21 = sld [smem:[#allocation13_spill]] }
 0xa55   : > { %p1824_p1 = scmp.ge.s32.totalorder %s2514_s20, 2  ;;  %s1537_s29 = sand.u32 1, %s2515_s24  }
 0xa56   : > { %p2517_p3 = scmp.ne.s32.totalorder %s2516_s21, 0  ;;  %s1538_s17 = scalar_lea.sflag [#allocation4], %s1537_s29 }
 0xa58   : > { %p1819_p5 = pnand %p1824_p1, %p2517_p3 }
 0xa5a   : > { %2014 = dma.done.wait (!%p1819_p5), %s1538_s17, 128  }
 0xa5b   : > { %2016 = vsyncadd (!%p1819_p5), %s1538_s17, 4294967168  ;;  %s30_s26 = sadd.s32 1, %s2514_s20   ;;  %s2518_s18 = sld [smem:[#allocation9_spill]] }
 0xa5c   : > { %p27_p6 = scmp.ge.s32.totalorder %s30_s26, 4   ;;  %s2519_s23 = sld [smem:[#allocation14_spill]] }
 0xa5d   : > { %s2520_s24 = sld [smem:[#allocation10_spill]]  ;;  %s2521_s25 = sld [smem:[#allocation12_spill]] }
 0xa5e   : > { %s2522_s21 = smov %s2023_s22  ;;  %29 = sbr.rel (!%p27_p6) target bundleno = 7 (0x7), region = 127 }
 0xa61   : > { %s2523_s22 = smov %s2518_s18 }
 0xa65   :  { %1543 = vsyncpa [#allocation3], 1 }
 0xa66   :  { %1545 = vsyncpa [#allocation3 + $0x1], 1 }
 0xa67   :  { %1546 = vsyncpa [#allocation4], 1 }
 0xa68   :  { %1548 = vsyncpa [#allocation4 + $0x1], 1 }

</bundles_post_ra>
